<compile_context>
chip_gen: v7x
topology: tpu7x:2x2x1
jax: 0.10.0
libtpu: 0.0.40
codegen_flags: <defaults>
</compile_context>

<pallas_src>
import jax
import jax.numpy as jnp
from jax import lax
from jax.experimental import pallas as pl
from jax.experimental.pallas import tpu as pltpu


def _round_up(x, m):
    return ((x + m - 1) // m) * m


def _vmem_capacity_bytes():
    """Physical per-core VMEM; conservative fallback if the query fails."""
    try:
        cap = int(pltpu.get_tpu_info().vmem_capacity_bytes)
        if cap > 0:
            return cap
    except Exception:
        pass
    return 64 << 20  # v7x per-TC size: safe lower bound across generations


# ---------------------------------------------------------------------------
# Path 1: VMEM-resident table, gather expressed as one-hot MXU matmul.
# ---------------------------------------------------------------------------
def _label_embed_matmul_kernel(lbl_ref, table_ref, out_ref):
    # lbl_ref:   (TB, 1)  int32 effective labels for this output slab
    # table_ref: (C1, H)  full embedding table, VMEM-resident (single buffer)
    # out_ref:   (TB, H)  lane-dense output slab
    tb = out_ref.shape[0]
    c1 = table_ref.shape[0]
    lbl = lbl_ref[...]                                              # (TB, 1)
    class_ids = lax.broadcasted_iota(jnp.int32, (tb, c1), 1)        # (TB, C1)
    onehot = (lbl == class_ids).astype(table_ref.dtype)             # (TB, C1)
    # HIGHEST precision: for a one-hot LHS the bf16 multi-pass decomposition
    # of the f32 table reconstructs the selected row exactly (bit-exact
    # gather), matching nn.Embedding numerics.
    out_ref[...] = jnp.dot(
        onehot, table_ref[...],
        preferred_element_type=jnp.float32,
        precision=lax.Precision.HIGHEST,
    ).astype(out_ref.dtype)


def _label_embed_vmem(eff2d, table, tb, vmem_limit):
    b_pad = eff2d.shape[0]
    c1, h = table.shape
    return pl.pallas_call(
        _label_embed_matmul_kernel,
        out_shape=jax.ShapeDtypeStruct((b_pad, h), table.dtype),
        grid_spec=pl.GridSpec(
            grid=(b_pad // tb,),
            in_specs=[
                pl.BlockSpec((tb, 1), lambda i: (i, 0)),     # labels slab
                # Constant block index across the grid -> one table DMA total;
                # Buffered(1) keeps a single (not double) VMEM copy resident.
                pl.BlockSpec((c1, h), lambda i: (0, 0),
                             pipeline_mode=pl.Buffered(1)),
            ],
            out_specs=pl.BlockSpec((tb, h), lambda i: (i, 0)),
        ),
        compiler_params=pltpu.CompilerParams(
            # Independent output tiles; note this does NOT shard across TCs.
            dimension_semantics=("parallel",),
            vmem_limit_bytes=vmem_limit),
    )(eff2d, table)


# ---------------------------------------------------------------------------
# Path 2: table stays in HBM; per-row DMA gather driven by scalar-prefetched
# labels (mandatory for tables that don't fit VMEM, and cheaper than the
# one-hot matmul for very large num_classes).
# ---------------------------------------------------------------------------
def _label_embed_gather_kernel(lbl_smem, table_hbm, out_ref, sem):
    # lbl_smem:  (B_pad,) int32 effective labels in SMEM (scalar prefetch)
    # table_hbm: (C1, H)  raw HBM ref (memory_space=pl.ANY)
    # out_ref:   (TB, H)  lane-dense output slab (DMA destination)
    i = pl.program_id(0)
    tb = out_ref.shape[0]

    @pl.loop(0, tb)
    def _issue(r):
        row = lbl_smem[i * tb + r]
        pltpu.make_async_copy(
            table_hbm.at[pl.ds(row, 1), :],
            out_ref.at[pl.ds(r, 1), :],
            sem,
        ).start()

    @pl.loop(0, tb)
    def _drain(r):
        # All row copies are the same size; tb waits on the shared DMA
        # semaphore drain every completion signal before the block is
        # written back by the pipeline.
        pltpu.make_async_copy(
            table_hbm.at[pl.ds(0, 1), :],
            out_ref.at[pl.ds(r, 1), :],
            sem,
        ).wait()


def _label_embed_hbm_gather(eff, table, tb, vmem_limit):
    b_pad = eff.shape[0]
    _, h = table.shape
    return pl.pallas_call(
        _label_embed_gather_kernel,
        out_shape=jax.ShapeDtypeStruct((b_pad, h), table.dtype),
        grid_spec=pltpu.PrefetchScalarGridSpec(
            num_scalar_prefetch=1,
            grid=(b_pad // tb,),
            in_specs=[pl.BlockSpec(memory_space=pl.ANY)],        # table in HBM
            out_specs=pl.BlockSpec((tb, h), lambda i, lbl: (i, 0)),
            scratch_shapes=[pltpu.SemaphoreType.DMA(())],
        ),
        compiler_params=pltpu.CompilerParams(
            dimension_semantics=("arbitrary",),
            vmem_limit_bytes=vmem_limit),
    )(eff, table)


# ---------------------------------------------------------------------------
# Wrapper: CFG label drop fused outside, strategy selection, tail padding.
# ---------------------------------------------------------------------------
def label_embed_pallas(labels, drop_ids, table, num_classes, *, gather="auto"):
    """Gather table[where(drop, num_classes, labels)] -> (B, H).

    gather: "auto" | "vmem" | "hbm"
    """
    B = labels.shape[0]
    C1, H = table.shape
    itemsize = jnp.dtype(table.dtype).itemsize

    # Classifier-free-guidance token drop fused into the effective label
    # vector once, outside the kernel (single tiny elementwise op).
    eff = jnp.where(drop_ids != 0, num_classes, labels).astype(jnp.int32)

    # Output slab: multiple of 8 sublanes, up to 512 rows per grid step
    # (amortizes the ~600-cycle per-step overhead and the MXU RHS push).
    TB = min(512, _round_up(B, 8))
    B_pad = _round_up(B, TB)
    if B_pad != B:
        # Tail rows padded with label 0 (valid row); sliced off below.
        eff = jnp.pad(eff, (0, B_pad - B))

    vmem_cap = _vmem_capacity_bytes()
    vmem_budget = int(vmem_cap * 0.8)
    headroom = 2 << 20

    # VMEM need, resident path:
    #   table: single buffer (Buffered(1))
    #   labels: (TB,1) int32 blocks lane-pad to (TB,128) words, double-buffered
    #   output: (TB,H) slabs, double-buffered
    resident_need = (C1 * H * itemsize
                     + 2 * TB * 128 * 4
                     + 2 * TB * H * itemsize
                     + headroom)
    # VMEM need, HBM-gather path: just the double-buffered output slabs.
    gather_need = 2 * TB * H * itemsize + headroom

    if gather == "auto":
        # Fall back to HBM gather when the table blows the VMEM budget, or
        # when C1 is large enough that the one-hot matmul is MXU-bound.
        use_hbm = (resident_need > vmem_budget) or (C1 > 4096)
    else:
        use_hbm = (gather == "hbm")

    if use_hbm:
        vmem_limit = min(max(gather_need, 4 << 20), vmem_budget)
        out = _label_embed_hbm_gather(eff, table, TB, vmem_limit)
    else:
        vmem_limit = min(max(resident_need, 4 << 20), vmem_budget)
        out = _label_embed_vmem(eff.reshape(B_pad, 1), table, TB, vmem_limit)

    return out[:B] if B_pad != B else out


class LabelEmbedder:
    """JAX/Pallas port of the PyTorch LabelEmbedder."""

    def __init__(self, num_classes, hidden_size, dropout_prob, *, param_key):
        use_cfg_embedding = int(dropout_prob > 0)
        # nn.Embedding default init: N(0, 1)
        self.embedding_table = jax.random.normal(
            param_key, (num_classes + use_cfg_embedding, hidden_size),
            dtype=jnp.float32)
        self.num_classes = num_classes
        self.dropout_prob = dropout_prob

    def _drop_ids(self, labels, train, force_drop_ids, rng_key):
        B = labels.shape[0]
        use_dropout = self.dropout_prob > 0
        if (train and use_dropout) or (force_drop_ids is not None):
            if force_drop_ids is None:
                if rng_key is None:
                    raise ValueError(
                        "rng_key is required when train=True and "
                        "dropout_prob > 0 (label dropout needs randomness).")
                u = jax.random.uniform(rng_key, (B,), dtype=jnp.float32)
                return (u < self.dropout_prob).astype(jnp.int32)
            return (force_drop_ids == 1).astype(jnp.int32)
        return jnp.zeros((B,), dtype=jnp.int32)

    def forward(self, labels, train, force_drop_ids=None, rng_key=None):
        drop_ids = self._drop_ids(labels, train, force_drop_ids, rng_key)
        return label_embed_pallas(labels, drop_ids, self.embedding_table,
                                  self.num_classes)


if __name__ == "__main__":
    key = jax.random.PRNGKey(0)
    k_param, k_labels, k_drop = jax.random.split(key, 3)

    num_classes = 10
    hidden_size = 128
    dropout_prob = 0.1
    batch = 8

    embedder = LabelEmbedder(num_classes, hidden_size, dropout_prob,
                             param_key=k_param)
    labels = jax.random.randint(k_labels, (batch,), 0, num_classes,
                                dtype=jnp.int32)

    # train=True path (label dropout active, driven by k_drop)
    emb = embedder.forward(labels, train=True, rng_key=k_drop)
    emb = jax.block_until_ready(emb)

    # pure-JAX reference for correctness
    u = jax.random.uniform(k_drop, (batch,), dtype=jnp.float32)
    eff_labels = jnp.where(u < dropout_prob, num_classes, labels)
    ref = jnp.take(embedder.embedding_table, eff_labels, axis=0)
    assert emb.shape == (batch, hidden_size)
    assert emb.dtype == jnp.float32
    assert jnp.allclose(emb, ref)

    # eval path (no dropout) should match a plain table lookup
    emb_eval = jax.block_until_ready(embedder.forward(labels, train=False))
    ref_eval = jnp.take(embedder.embedding_table, labels, axis=0)
    assert jnp.allclose(emb_eval, ref_eval)

    # forced-drop path (force_drop_ids == 1 everywhere -> CFG null token)
    force = jnp.ones((batch,), dtype=jnp.int32)
    emb_forced = jax.block_until_ready(
        embedder.forward(labels, train=False, force_drop_ids=force))
    ref_forced = jnp.broadcast_to(embedder.embedding_table[num_classes],
                                  (batch, hidden_size))
    assert jnp.allclose(emb_forced, ref_forced)

    # non-multiple-of-8 batch exercises the tail-padding path
    labels_odd = labels[:5]
    emb_odd = jax.block_until_ready(embedder.forward(labels_odd, train=False))
    ref_odd = jnp.take(embedder.embedding_table, labels_odd, axis=0)
    assert emb_odd.shape == (5, hidden_size)
    assert jnp.allclose(emb_odd, ref_odd)

    # HBM row-gather fallback path (forced), exact by construction
    zero_drop = jnp.zeros((batch,), dtype=jnp.int32)
    emb_gather = jax.block_until_ready(
        label_embed_pallas(labels, zero_drop, embedder.embedding_table,
                           num_classes, gather="hbm"))
    assert jnp.allclose(emb_gather, ref_eval)

    print("KERNEL_OK")
</pallas_src>

<mosaic_0001>
module attributes {stable_mosaic.version = 11 : i64} {
  func.func @_label_embed_matmul_kernel(%arg0: i32, %arg1: memref<8x1xi32, #tpu.memory_space<vmem>>, %arg2: memref<11x128xf32, #tpu.memory_space<vmem>>, %arg3: memref<8x128xf32, #tpu.memory_space<vmem>>) attributes {dimension_semantics = [#tpu.dimension_semantics<parallel>], iteration_bounds = array<i64: 1>, scalar_prefetch = 0 : i64, scratch_operands = 0 : i64, tpu.core_type = #tpu.core_type<tc>, window_params = [{transform_indices = @transform_0, window_bounds = array<i64: 8, 1>}, {pipeline_mode = #tpu.pipeline_mode<synchronous>, transform_indices = @transform_1, window_bounds = array<i64: 11, 128>}, {transform_indices = @transform_2, window_bounds = array<i64: 8, 128>}]} {
    %c0 = arith.constant 0 : index
    %c0_0 = arith.constant 0 : index
    %0 = vector.load %arg1[%c0, %c0_0] : memref<8x1xi32, #tpu.memory_space<vmem>>, vector<8x1xi32>
    %1 = tpu.iota {dimensions = array<i32: 1>} : vector<8x11xi32>
    %2 = vector.broadcast %0 : vector<8x1xi32> to vector<8x11xi32>
    %3 = arith.cmpi eq, %2, %1 : vector<8x11xi32>
    %4 = arith.extui %3 : vector<8x11xi1> to vector<8x11xi32>
    %5 = arith.sitofp %4 : vector<8x11xi32> to vector<8x11xf32>
    %c0_1 = arith.constant 0 : index
    %c0_2 = arith.constant 0 : index
    %6 = vector.load %arg2[%c0_1, %c0_2] : memref<11x128xf32, #tpu.memory_space<vmem>>, vector<11x128xf32>
    %cst = arith.constant dense<0.000000e+00> : vector<8x128xf32>
    %7 = tpu.matmul %5, %6, %cst {dimension_numbers = #tpu.dot_dimension_numbers<[1], [0], [0], [1], [0, 0, 1, 1], [], []>, precision = #tpu.contract_precision<fp32>} : vector<8x11xf32>, vector<11x128xf32>, vector<8x128xf32> -> vector<8x128xf32>
    %c0_3 = arith.constant 0 : index
    %c0_4 = arith.constant 0 : index
    %8 = vector.load %arg3[%c0_3, %c0_4] : memref<8x128xf32, #tpu.memory_space<vmem>>, vector<8x128xf32>
    tpu.vector_store %arg3[%c0_3, %c0_4], %7 {strides = array<i32>} : memref<8x128xf32, #tpu.memory_space<vmem>>, vector<8x128xf32>,
    return
  }
  func.func @transform_0(%arg0: i32) -> (i32, i32) {
    %c0_i32 = arith.constant 0 : i32
    %c0_i32_0 = arith.constant 0 : i32
    return %arg0, %c0_i32 : i32, i32
  }
  func.func @transform_1(%arg0: i32) -> (i32, i32) {
    %c0_i32 = arith.constant 0 : i32
    %c0_i32_0 = arith.constant 0 : i32
    %c0_i32_1 = arith.constant 0 : i32
    return %c0_i32, %c0_i32_0 : i32, i32
  }
  func.func @transform_2(%arg0: i32) -> (i32, i32) {
    %c0_i32 = arith.constant 0 : i32
    %c0_i32_0 = arith.constant 0 : i32
    return %arg0, %c0_i32 : i32, i32
  }
}

</mosaic_0001>

<bundles_post_ra>
// kernel: tpu_custom_call.1
= control target key start
LH: loop header
LB: loop body
LE: loop exit
PB: predicated region body
PF: predicated region fallthrough
CT: control target
= control target key end

     0   :  { %7 = vsyncpa [#allocation3], 0  ;;  %s728_s0 = inlined_call_operand.vmem [shape: s32[8,1], index: 0, kind: input, shape index: {}]   ;;  %s729_s1 = inlined_call_operand.hbm [shape: f32[11,128], index: 1, kind: input, shape index: {}]   ;;  %s730_s2 = inlined_call_operand.hbm [shape: f32[8,128], index: 2, kind: output, shape index: {}]  }
   0x1   :  { %8 = vsyncpa [#allocation4], 0  ;;  %s668_s9 = smov [#allocation2]   ;;  %s620_s13 = scalar_lea.hbm %s729_s1, 256 }
   0x2   :  { %s16_s10 = sshll.u32 %s668_s9, 4  ;;  %p621_p0 = scmp.ne.s32.totalorder %s729_s1, %s620_s13  ;;  %s17_s10 = int_to_ptr.vmem [resolvable:$true] %s16_s10 }
   0x3   :  { %p624_p1 = scmp.lt.u32.totalorder %s620_s13, %s729_s1 }
   0x5   :  { %p626_p2 = pnand %p624_p1, %p621_p0 }
   0x7   :  { %629 = shalt.err (!%p626_p2)
}
   0x8   :  { %s630_s18 = scalar_lea.vmem %s17_s10, 256  ;;  %p635_p4 = scmp.lt.s32.totalorder %s17_s10, %s17_s10 }
   0x9   :  { %p631_p3 = scmp.ne.s32.totalorder %s17_s10, %s630_s18  ;;  %p636_p5 = scmp.lt.s32.totalorder %s630_s18, %s630_s18 }
   0xb   :  { %p637_p6 = por %p636_p5, %p635_p4 }
   0xd   :  { %p638_p7 = pnand %p637_p6, %p631_p3 }
   0xf   :  { %641 = shalt.err (!%p638_p7)
}
  0x10   :  { %s669_s19 = smov 128   ;;  %s670_s20 = smov 8  }
  0x11   :  { %22 = dma.hbm_to_vmem [thread:$0]  %s729_s1, 256, %s17_s10, [#allocation3], %s669_s19, %s669_s19, %s670_s20  }
  0x12   :  { %664 = dma.done.wait [#allocation3], 256  }
  0x13   :  { %665 = vsyncadd [#allocation3], 4294967040  ;;  %v671_v0 = vmov 0   ;;  %vm41_vm0 = vcmask 1042432   ;;  %v26_v1 = vld [vmem:[%s728_s0] sm:$0xff]  ;;  %v672_v7 = vmov 0.0|0.0   ;;  %v27_v21 = vlaneseq }
  0x14   :  { %619 = vset.pattern.permute.xlu0 %v671_v0  ;;  %v35_v2 = vld [vmem:[#allocation2] sm:$0xff]  ;;  %v36_v3 = vld [vmem:[#allocation2 + $0x8] sm:$0x7]  ;;  %593 = vmatprep.subr.bf16.mxu0 %v672_v7  ;;  %vm673_vm1 = vmmov 0   ;;  %v674_v11 = vmov 0.0   ;;  %vm37_vm2 = vcmask 89088  }
  0x15   :  { %30 = vperm.xlu0 %619, %v26_v1   ;;  %v43_v4 = vsel %vm41_vm0, %v36_v3, 0  ;;  %v46_v5 = vand.u32 4294901760, %v35_v2  ;;  %584 = vmatprep.subr.bf16.mxu1 %v672_v7  ;;  %v28_v22 = vand.u32 127, %v27_v21  ;;  %s675_s0 = smov [#allocation5]  }
  0x16   :  { %v49_v6 = vand.u32 4294901760, %v43_v4  ;;  %567 = vmatprep.mubr.msk.f32.mxu0 %vm673_vm1, %v674_v11  ;;  %546 = vmatprep.mubr.msk.f32.mxu1 %vm673_vm1, %v674_v11  ;;  %s511_s1 = sshll.u32 %s675_s0, 4  ;;  %s512_s1 = int_to_ptr.vmem [resolvable:$true] %s511_s1 }
  0x17   :  { %v124_v9 = vsub.f32 %v35_v2, %v46_v5  ;;  %s642_s25 = scalar_lea.vmem %s512_s1, 128  ;;  %p647_p9 = scmp.lt.s32.totalorder %s512_s1, %s512_s1 }
  0x18   :  { %v585_v8 = vpack.c.bf16 %v49_v6, %v46_v5  ;;  %v131_v10 = vsub.f32 %v43_v4, %v49_v6  ;;  %p643_p8 = scmp.ne.s32.totalorder %s512_s1, %s642_s25  ;;  %p648_p10 = scmp.lt.s32.totalorder %s642_s25, %s642_s25 }
  0x19   :  { %v125_v12 = vand.u32 4294901760, %v124_v9 }
  0x1a   :  { %595 = vmatpush3.bf16.msra.mxu0 %v585_v8  ;;  %586 = vmatpush3.bf16.msra.mxu1 %v585_v8  ;;  %v132_v13 = vand.u32 4294901760, %v131_v10  ;;  %v591_v20 = vpack.c.bf16 %v131_v10, %v124_v9  ;;  %p649_p11 = por %p648_p10, %p647_p9 }
  0x1b   :  { %587 = vmatprep.subr.bf16.mxu1 %v672_v7  ;;  %596 = vmatprep.subr.bf16.mxu0 %v672_v7  ;;  %v126_v14 = vsub.f32 %v124_v9, %v125_v12 }
  0x1c   :  { %v133_v15 = vsub.f32 %v131_v10, %v132_v13  ;;  %v597_v16 = vpack.c.bf16 %v132_v13, %v125_v12  ;;  %p650_p12 = pnand %p649_p11, %p643_p8 }
  0x1d   :  { %v127_v17 = vand.u32 4294901760, %v126_v14 }
  0x1e   :  { %v134_v18 = vand.u32 4294901760, %v133_v15 }
  0x20   :  { %v588_v19 = vpack.c.bf16 %v134_v18, %v127_v17 }
  0x94   :  { %v31_v23 = vpop.permute.xlu0 %30 }
  0x95   :  { %vm32_vm3 = vcmp.eq.s32.totalorder %v31_v23, %v28_v22 }
  0x96   :  { %v520_v24 = vsel %vm32_vm3, 1.0, %v674_v11 }
  0x97   :  { %v39_v25 = vsel %vm37_vm2, %v520_v24, 0 }
  0x98   :  { %v113_v26 = vsub.f32 %v39_v25, %v39_v25 }
  0x9a   :  { %v114_v27 = vand.u32 4294901760, %v113_v26 }
  0x9c   :  { %568 = vmatmul.mubr.f32.vlgmr.msra.gmra.mrb[0].mxu0 %v114_v27  ;;  %v115_v28 = vsub.f32 %v113_v26, %v114_v27 }
  0x9d   :  { %598 = vmatpush3.bf16.msra.mxu0 %v597_v16  ;;  %574 = vmatprep.mubr.msk.f32.mxu0 %vm673_vm1, %v674_v11 }
  0x9e   :  { %v116_v29 = vand.u32 4294901760, %v115_v28  ;;  %599 = vmatprep.subr.bf16.mxu0 %v672_v7 }
  0xa0   :  { %547 = vmatmul.mubr.f32.vlgmr.msra.gmra.mrb[0].mxu1 %v116_v29 }
  0xa1   :  { %589 = vmatpush3.bf16.msra.mxu1 %v588_v19  ;;  %553 = vmatprep.mubr.msk.f32.mxu1 %vm673_vm1, %v674_v11 }
  0xa2   :  { %590 = vmatprep.subr.bf16.mxu1 %v672_v7 }
  0xa4   :  { %575 = vmatmul.mubr.msk.f32.vlgmr.msra.gmra.mrb[0].mxu0 %vm37_vm2, %v520_v24 }
  0xa5   :  { %601 = vmatpush3.bf16.msra.mxu0 %v585_v8  ;;  %581 = vmatprep.mubr.msk.f32.mxu0 %vm673_vm1, %v674_v11 }
  0xa8   :  { %554 = vmatmul.mubr.msk.f32.vlgmr.msra.gmra.mrb[0].mxu1 %vm37_vm2, %v520_v24 }
  0xa9   :  { %592 = vmatpush3.bf16.msra.mxu1 %v591_v20  ;;  %560 = vmatprep.mubr.msk.f32.mxu1 %vm673_vm1, %v674_v11 }
  0xac   :  { %582 = vmatmul.mubr.msk.f32.vlgmr.msra.gmra.mrb[0].mxu0 %vm37_vm2, %v520_v24 }
  0xb0   :  { %561 = vmatmul.mubr.f32.vlgmr.msra.gmra.mrb[0].mxu1 %v113_v26 }
 0x17f   :  { %v500_v30 = vpop.f32.mrb[0].mxu0 }
 0x180   :  { %v583_v31 = vpop.f32.mrb[1].mxu0 }
 0x183   :  { %v275_v32 = vpop.f32.mrb[0].mxu1 }
 0x184   :  { %v602_v33 = vadd.f32 %v500_v30, %v275_v32  ;;  %v562_v34 = vpop.f32.mrb[1].mxu1 }
 0x186   :  { %504 = vst [vmem:[#allocation5] sm:$0xff] %v602_v33 }
 0x187   :  { %653 = shalt.err (!%p650_p12)
}
 0x188   :  { %s654_s28 = scalar_lea.hbm %s730_s2, 128 }
 0x189   :  { %p655_p13 = scmp.ne.s32.totalorder %s730_s2, %s654_s28  ;;  %p658_p0 = scmp.lt.u32.totalorder %s654_s28, %s730_s2 }
 0x18b   :  { %p660_p1 = pnand %p658_p0, %p655_p13 }
 0x18d   :  { %663 = shalt.err (!%p660_p1)
}
 0x18e   :  { %514 = dma.vmem_to_hbm [thread:$0]  %s512_s1, 128, %s730_s2, [#allocation4]  }
 0x18f   :  { %666 = dma.done.wait [#allocation4], 128  }
 0x190   :  { %667 = vsyncadd [#allocation4], 4294967168 }
 0x191   :  { %518 = vsyncpa [#allocation3], 1 }
 0x192   :  { %519 = vsyncpa [#allocation4], 1 }

</bundles_post_ra>
